<compile_context>
chip_gen: v7x
topology: tpu7x:2x2x1
jax: 0.10.0
libtpu: 0.0.40
codegen_flags: <defaults>
</compile_context>

<pallas_src>
import math

import jax
import jax.numpy as jnp
from jax.experimental import pallas as pl
from jax.experimental.pallas import tpu as pltpu


def _round_up(a, m):
    return ((a + m - 1) // m) * m


def _plan_tiles(n):
    """Choose (n_pad, tile_n, tile_k) for the (n_pad, n_pad) int8 adjacency.

    tile_n x tile_k bounds the streamed adjacency block independently of graph
    size.  Whenever n_pad >= 256 there are at least two row tiles so v7x's two
    TensorCores both get work; for large graphs tile_k is widened (up to 4096)
    so the ~0.35 us per-grid-step overhead stays small relative to tile DMA.
    """
    if n <= 512:
        n_pad = max(_round_up(n, 128), 128)
        tile_n = 128 if n_pad >= 256 else n_pad
        return n_pad, tile_n, n_pad                # single contraction step
    n_pad = _round_up(n, 512)
    tile_k = 512
    for cand in (4096, 2048, 1024):
        if n_pad % cand == 0:
            tile_k = cand
            break
    return n_pad, 512, tile_k


def _sag_score_kernel(adj_ref, x_ref, v_ref, w_root_ref, b_ref, score_ref, acc_ref):
    """One (row-tile, col-tile) step of score = tanh(Adj @ v + x @ w_root + b).

    GraphConv(C, 1):  y_i = w_root . x_i + w_rel . (sum_{j -> i} x_j) + b,
    reordered so the dense adjacency only ever multiplies v = x @ w_rel (N, 1).
    """
    k = pl.program_id(1)

    @pl.when(k == 0)
    def _():
        acc_ref[...] = jnp.zeros_like(acc_ref)

    # Dominant HBM stream: (tile_n, tile_k) int8 adjacency tile.  Upcast on the
    # VPU (v7x's MXU has no integer path); accumulation stays f32.
    adj = adj_ref[...].astype(jnp.float32)
    acc_ref[...] += jnp.dot(adj, v_ref[...], preferred_element_type=jnp.float32)

    @pl.when(k == pl.num_programs(1) - 1)
    def _():
        root = jnp.dot(x_ref[...], w_root_ref[...],
                       preferred_element_type=jnp.float32)            # (tile_n, 1)
        # NOTE: (tile_n, 1) output uses masked lane stores; negligible next to
        # the adjacency stream.
        score_ref[...] = jnp.tanh(acc_ref[...] + root + b_ref[0, 0])


def sag_pool_scores(adj_i8, x_pad, v_pad, w_root, b, *, tile_n, tile_k):
    """Pallas call wrapper: returns padded scores (n_pad, 1) float32."""
    n_pad = adj_i8.shape[0]
    c = x_pad.shape[1]
    grid = (n_pad // tile_n, n_pad // tile_k)

    # Bounded footprint: double-buffered int8 adj tile + streamed x/v tiles +
    # tiny weights + output + f32 accumulator scratch.
    footprint = (2 * tile_n * tile_k            # adj int8, 2 buffers
                 + 2 * tile_n * c * 4           # x row tile
                 + 2 * tile_k * 4               # v column tile
                 + 2 * c * 4                    # w_root
                 + 2 * tile_n * 4               # score out
                 + tile_n * 4)                  # accumulator scratch
    vmem_limit = int(min(48 * 2 ** 20, max(16 * 2 ** 20, 8 * footprint)))

    return pl.pallas_call(
        _sag_score_kernel,
        out_shape=jax.ShapeDtypeStruct((n_pad, 1), jnp.float32),
        grid=grid,
        in_specs=[
            pl.BlockSpec((tile_n, tile_k), lambda i, k: (i, k)),      # adj (streamed)
            pl.BlockSpec((tile_n, c), lambda i, k: (i, 0)),           # x row tile
            pl.BlockSpec((tile_k, 1), lambda i, k: (k, 0)),           # v = x @ w_rel (hoisted)
            pl.BlockSpec((c, 1), lambda i, k: (0, 0)),                # w_root (resident)
            pl.BlockSpec((1, 1), lambda i, k: (0, 0),
                         memory_space=pltpu.MemorySpace.SMEM),        # bias scalar
        ],
        out_specs=pl.BlockSpec((tile_n, 1), lambda i, k: (i, 0)),
        scratch_shapes=[pltpu.VMEM((tile_n, 1), jnp.float32)],
        compiler_params=pltpu.CompilerParams(
            dimension_semantics=("parallel", "arbitrary"),            # megacore rows / seq cols
            vmem_limit_bytes=vmem_limit),
    )(adj_i8, x_pad, v_pad, w_root, b)


def sag_pooling(x, edge_index, w_rel, w_root, b, *, ratio=0.5, multiplier=1.0):
    """Full SAGPooling forward (min_score=None, single-graph batch of zeros).

    Returns (x_out, edge_index_out, edge_attr_out, batch_out, perm, score_perm),
    mirroring the PyTorch module's return signature (edge_attr_out is None).
    """
    N, C = x.shape
    batch = jnp.zeros((N,), dtype=jnp.int32)
    src, dst = edge_index[0], edge_index[1]

    n_pad, tile_n, tile_k = _plan_tiles(N)

    # Dense adjacency adj[dst, src] = edge multiplicity, built directly in its
    # final int8 dtype (exact for multiplicities <= 127; heavier multigraph
    # duplicate edges would wrap — not the case for typical benchmark graphs).
    # TODO(synk): for large sparse graphs (E << N^2), replace the dense O(N^2)
    # densification with an edge-driven CSR / segment-sum scalar-prefetch kernel.
    adj = jnp.zeros((n_pad, n_pad), jnp.int8).at[dst, src].add(
        jnp.ones_like(dst, dtype=jnp.int8))

    x_pad = jnp.zeros((n_pad, C), jnp.float32).at[:N].set(x.astype(jnp.float32))
    v_pad = jnp.dot(x_pad, w_rel.astype(jnp.float32))                 # (n_pad, 1), hoisted

    # --- Pallas hot path: streamed Adj @ v + root projection + bias + tanh -----
    # TODO(synk): for many tiny graphs, batch G graphs per pallas_call and pack
    # their projection vectors as RHS columns (n_pad, G) to widen the MXU GEMV.
    score_pad = sag_pool_scores(adj, x_pad, v_pad, w_root.astype(jnp.float32),
                                b, tile_n=tile_n, tile_k=tile_k)
    score_flat = score_pad[:N, 0]                                     # (N,)

    # --- top-k node selection (single graph) ------------------------------------
    if isinstance(ratio, int):
        k = min(ratio, N)
    else:
        k = int(math.ceil(ratio * N))
    _, perm = jax.lax.top_k(score_flat, k)        # descending, like PyG topk
    perm = perm.astype(jnp.int32)

    score_perm = score_flat[perm]
    x_out = x[perm] * score_perm[:, None]         # gate only the k survivors
    if multiplier != 1.0:
        x_out = multiplier * x_out
    batch_out = batch[perm]

    # --- filter_adj: keep edges whose endpoints survive; remap indices ----------
    # TODO(synk): data-dependent output shape; eager-only (use a padded/masked
    # edge list if this path ever needs to run under jax.jit).
    keep = jnp.zeros((N,), bool).at[perm].set(True)
    new_index = jnp.full((N,), -1, jnp.int32).at[perm].set(
        jnp.arange(k, dtype=jnp.int32))
    emask = keep[src] & keep[dst]
    src_kept = src[emask]
    dst_kept = dst[emask]
    edge_index_out = jnp.stack([new_index[src_kept], new_index[dst_kept]])
    edge_attr_out = None  # module default: edge_attr is None

    return x_out, edge_index_out, edge_attr_out, batch_out, perm, score_perm


if __name__ == "__main__":
    key = jax.random.PRNGKey(0)
    N, C, E = 16, 8, 32                    # nodes, in_channels, edges
    k1, k2, k3, k4, k5 = jax.random.split(key, 5)

    # Deterministic synthetic graph + features.
    x = jax.random.normal(k1, (N, C), jnp.float32)
    src = jax.random.randint(k2, (E,), 0, N, dtype=jnp.int32)
    dst = jax.random.randint(k3, (E,), 0, N, dtype=jnp.int32)
    edge_index = jnp.stack([src, dst])

    # GraphConv(in_channels=C, out_channels=1) parameters.
    # lin_rel: weight (1, C) + bias (1,); lin_root: weight (1, C), no bias.
    bound = 1.0 / math.sqrt(C)
    w_rel = jax.random.uniform(k4, (C, 1), jnp.float32, -bound, bound)
    w_root = jax.random.uniform(k5, (C, 1), jnp.float32, -bound, bound)
    b = jnp.zeros((1, 1), jnp.float32)

    out = sag_pooling(x, edge_index, w_rel, w_root, b, ratio=0.5, multiplier=1.0)
    x_out, edge_index_out, edge_attr_out, batch_out, perm, score_perm = out
    jax.block_until_ready((x_out, edge_index_out, batch_out, perm, score_perm))
    print("KERNEL_OK")
</pallas_src>

<mosaic_0001>
module attributes {stable_mosaic.version = 11 : i64} {
  func.func @_sag_score_kernel(%arg0: i32, %arg1: i32, %arg2: memref<128x128xi8, #tpu.memory_space<vmem>>, %arg3: memref<128x8xf32, #tpu.memory_space<vmem>>, %arg4: memref<128x1xf32, #tpu.memory_space<vmem>>, %arg5: memref<8x1xf32, #tpu.memory_space<vmem>>, %arg6: memref<1x1xf32, #tpu.memory_space<smem>>, %arg7: memref<128x1xf32, #tpu.memory_space<vmem>>, %arg8: memref<128x1xf32, #tpu.memory_space<vmem>>) attributes {dimension_semantics = [#tpu.dimension_semantics<parallel>, #tpu.dimension_semantics<arbitrary>], iteration_bounds = array<i64: 1, 1>, scalar_prefetch = 0 : i64, scratch_operands = 1 : i64, tpu.core_type = #tpu.core_type<tc>, window_params = [{transform_indices = @transform_0, window_bounds = array<i64: 128, 128>}, {transform_indices = @transform_1, window_bounds = array<i64: 128, 8>}, {transform_indices = @transform_2, window_bounds = array<i64: 128, 1>}, {pipeline_mode = #tpu.pipeline_mode<synchronous>, transform_indices = @transform_3, window_bounds = array<i64: 8, 1>}, {transform_indices = @transform_4, window_bounds = array<i64: 1, 1>}, {transform_indices = @transform_5, window_bounds = array<i64: 128, 1>}]} {
    %c0_i32 = arith.constant 0 : i32
    %0 = arith.cmpi eq, %arg1, %c0_i32 : i32
    %1 = arith.extui %0 : i1 to i32
    %c0_i32_0 = arith.constant 0 : i32
    %2 = arith.cmpi ne, %1, %c0_i32_0 : i32
    scf.if %2 {
      %cst_10 = arith.constant 0.000000e+00 : f32
      %13 = vector.broadcast %cst_10 : f32 to vector<128x1xf32>
      %c0_11 = arith.constant 0 : index
      %c0_12 = arith.constant 0 : index
      %14 = vector.load %arg8[%c0_11, %c0_12] : memref<128x1xf32, #tpu.memory_space<vmem>>, vector<128x1xf32>
      tpu.vector_store %arg8[%c0_11, %c0_12], %13 {strides = array<i32>} : memref<128x1xf32, #tpu.memory_space<vmem>>, vector<128x1xf32>,
    } else {
    }
    %c0 = arith.constant 0 : index
    %c0_1 = arith.constant 0 : index
    %3 = vector.load %arg2[%c0, %c0_1] : memref<128x128xi8, #tpu.memory_space<vmem>>, vector<128x128xi8>
    %4 = arith.sitofp %3 : vector<128x128xi8> to vector<128x128xf32>
    %c0_2 = arith.constant 0 : index
    %c0_3 = arith.constant 0 : index
    %5 = vector.load %arg8[%c0_2, %c0_3] : memref<128x1xf32, #tpu.memory_space<vmem>>, vector<128x1xf32>
    %c0_4 = arith.constant 0 : index
    %c0_5 = arith.constant 0 : index
    %6 = vector.load %arg4[%c0_4, %c0_5] : memref<128x1xf32, #tpu.memory_space<vmem>>, vector<128x1xf32>
    %cst = arith.constant dense<0.000000e+00> : vector<128x1xf32>
    %7 = tpu.matmul %4, %6, %cst {dimension_numbers = #tpu.dot_dimension_numbers<[1], [0], [0], [1], [0, 0, 1, 1], [], []>} : vector<128x128xf32>, vector<128x1xf32>, vector<128x1xf32> -> vector<128x1xf32>
    %8 = arith.addf %5, %7 : vector<128x1xf32>
    %c0_6 = arith.constant 0 : index
    %c0_7 = arith.constant 0 : index
    %9 = vector.load %arg8[%c0_6, %c0_7] : memref<128x1xf32, #tpu.memory_space<vmem>>, vector<128x1xf32>
    tpu.vector_store %arg8[%c0_6, %c0_7], %8 {strides = array<i32>} : memref<128x1xf32, #tpu.memory_space<vmem>>, vector<128x1xf32>,
    %c0_i32_8 = arith.constant 0 : i32
    %10 = arith.cmpi eq, %arg1, %c0_i32_8 : i32
    %11 = arith.extui %10 : i1 to i32
    %c0_i32_9 = arith.constant 0 : i32
    %12 = arith.cmpi ne, %11, %c0_i32_9 : i32
    scf.if %12 {
      %c0_10 = arith.constant 0 : index
      %c0_11 = arith.constant 0 : index
      %13 = vector.load %arg3[%c0_10, %c0_11] : memref<128x8xf32, #tpu.memory_space<vmem>>, vector<128x8xf32>
      %c0_12 = arith.constant 0 : index
      %c0_13 = arith.constant 0 : index
      %14 = vector.load %arg5[%c0_12, %c0_13] : memref<8x1xf32, #tpu.memory_space<vmem>>, vector<8x1xf32>
      %cst_14 = arith.constant dense<0.000000e+00> : vector<128x1xf32>
      %15 = tpu.matmul %13, %14, %cst_14 {dimension_numbers = #tpu.dot_dimension_numbers<[1], [0], [0], [1], [0, 0, 1, 1], [], []>} : vector<128x8xf32>, vector<8x1xf32>, vector<128x1xf32> -> vector<128x1xf32>
      %c0_15 = arith.constant 0 : index
      %c0_16 = arith.constant 0 : index
      %16 = vector.load %arg8[%c0_15, %c0_16] : memref<128x1xf32, #tpu.memory_space<vmem>>, vector<128x1xf32>
      %17 = arith.addf %16, %15 : vector<128x1xf32>
      %c0_17 = arith.constant 0 : index
      %c0_18 = arith.constant 0 : index
      %18 = memref.load %arg6[%c0_17, %c0_18] : memref<1x1xf32, #tpu.memory_space<smem>>
      %19 = vector.broadcast %18 : f32 to vector<128x1xf32>
      %20 = arith.addf %17, %19 : vector<128x1xf32>
      %21 = math.tanh %20 : vector<128x1xf32>
      %c0_19 = arith.constant 0 : index
      %c0_20 = arith.constant 0 : index
      %22 = vector.load %arg7[%c0_19, %c0_20] : memref<128x1xf32, #tpu.memory_space<vmem>>, vector<128x1xf32>
      tpu.vector_store %arg7[%c0_19, %c0_20], %21 {strides = array<i32>} : memref<128x1xf32, #tpu.memory_space<vmem>>, vector<128x1xf32>,
    } else {
    }
    return
  }
  func.func @transform_0(%arg0: i32, %arg1: i32) -> (i32, i32) {
    %c0_i32 = arith.constant 0 : i32
    return %arg0, %arg1 : i32, i32
  }
  func.func @transform_1(%arg0: i32, %arg1: i32) -> (i32, i32) {
    %c0_i32 = arith.constant 0 : i32
    %c0_i32_0 = arith.constant 0 : i32
    return %arg0, %c0_i32 : i32, i32
  }
  func.func @transform_2(%arg0: i32, %arg1: i32) -> (i32, i32) {
    %c0_i32 = arith.constant 0 : i32
    %c0_i32_0 = arith.constant 0 : i32
    return %arg1, %c0_i32 : i32, i32
  }
  func.func @transform_3(%arg0: i32, %arg1: i32) -> (i32, i32) {
    %c0_i32 = arith.constant 0 : i32
    %c0_i32_0 = arith.constant 0 : i32
    %c0_i32_1 = arith.constant 0 : i32
    return %c0_i32, %c0_i32_0 : i32, i32
  }
  func.func @transform_4(%arg0: i32, %arg1: i32) -> (i32, i32) {
    %c0_i32 = arith.constant 0 : i32
    %c0_i32_0 = arith.constant 0 : i32
    %c0_i32_1 = arith.constant 0 : i32
    return %c0_i32, %c0_i32_0 : i32, i32
  }
  func.func @transform_5(%arg0: i32, %arg1: i32) -> (i32, i32) {
    %c0_i32 = arith.constant 0 : i32
    %c0_i32_0 = arith.constant 0 : i32
    return %arg0, %c0_i32 : i32, i32
  }
}

</mosaic_0001>

<bundles_post_ra>
// kernel: tpu_custom_call.1
= control target key start
LH: loop header
LB: loop body
LE: loop exit
PB: predicated region body
PF: predicated region fallthrough
CT: control target
= control target key end

     0   :  { %vm25_vm0 = vcmask 7168   ;;  %v800_v3 = vmov 0.0   ;;  %vm308_vm1 = vcmask 64512   ;;  %s1117_s2 = inlined_call_operand.vmem [shape: f32[128,1], index: 2, kind: input, shape index: {}]   ;;  %s1118_s0 = inlined_call_operand.vmem [shape: s8[128,128], index: 0, kind: input, shape index: {}]   ;;  %s1119_s3 = inlined_call_operand.vmem [shape: f32[8,1], index: 3, kind: input, shape index: {}]   ;;  %s1120_s1 = inlined_call_operand.vmem [shape: f32[128,8], index: 1, kind: input, shape index: {}]   ;;  %s1121_s4 = inlined_call_operand.<no memory space> [shape: f32[1,1], index: 4, kind: input, shape index: {}]   ;;  %s1122_s5 = inlined_call_operand.vmem [shape: f32[128,1], index: 5, kind: output, shape index: {}]  }
   0x1   :  { %v94_v0 = vld [vmem:[%s1117_s2] sm:$0xff]  ;;  %v95_v1 = vld [vmem:[%s1117_s2 + $0x8] sm:$0xff]  ;;  %v96_v2 = vld [vmem:[%s1117_s2 + $0x10] sm:$0xff]  ;;  %27 = vst.msk [vmem:[#allocation2 + $0x8] sm:$0xff] %vm25_vm0, %v800_v3 }
   0x2   :  { %26 = vst.msk [vmem:[#allocation2] sm:$0xff] %vm25_vm0, %v800_v3  ;;  %28 = vst.msk [vmem:[#allocation2 + $0x10] sm:$0xff] %vm25_vm0, %v800_v3  ;;  %v735_v4 = vpack.c.bf16 %v95_v1, %v94_v0  ;;  %v97_v5 = vld [vmem:[%s1117_s2 + $0x18] sm:$0xff]  ;;  %v98_v7 = vld [vmem:[%s1117_s2 + $0x20] sm:$0xff] }
   0x3   :  { %29 = vst.msk [vmem:[#allocation2 + $0x18] sm:$0xff] %vm25_vm0, %v800_v3  ;;  %30 = vst.msk [vmem:[#allocation2 + $0x20] sm:$0xff] %vm25_vm0, %v800_v3  ;;  %v739_v6 = vpack.c.bf16 %v97_v5, %v96_v2  ;;  %v99_v8 = vld [vmem:[%s1117_s2 + $0x28] sm:$0xff]  ;;  %v100_v10 = vld [vmem:[%s1117_s2 + $0x30] sm:$0xff] }
   0x4   :  { %31 = vst.msk [vmem:[#allocation2 + $0x28] sm:$0xff] %vm25_vm0, %v800_v3  ;;  %32 = vst.msk [vmem:[#allocation2 + $0x30] sm:$0xff] %vm25_vm0, %v800_v3  ;;  %736 = vmatprep.subr.bf16.mxu0 %v735_v4  ;;  %v743_v9 = vpack.c.bf16 %v99_v8, %v98_v7  ;;  %v101_v11 = vld [vmem:[%s1117_s2 + $0x38] sm:$0xff]  ;;  %v874_v12 = vld [vmem:[%s1118_s0] sm:$0xff] }
   0x5   :  { %33 = vst.msk [vmem:[#allocation2 + $0x38] sm:$0xff] %vm25_vm0, %v800_v3  ;;  %34 = vst.msk [vmem:[#allocation2 + $0x40] sm:$0xff] %vm25_vm0, %v800_v3  ;;  %738 = vmatpush3.bf16.msra.mxu0 %v735_v4  ;;  %v46_v13 = vunpack.c.0.s8 %v874_v12  ;;  %v307_v14 = vld [vmem:[%s1119_s3] sm:$0xff]  ;;  %v292_v16 = vld [vmem:[%s1120_s1 + $0x8] sm:$0xff]  ;;  %v747_v19 = vpack.c.bf16 %v101_v11, %v100_v10  ;;  %v47_v41 = vunpack.c.1.s8 %v874_v12  ;;  %v48_v43 = vunpack.c.2.s8 %v874_v12 }
   0x6   :  { %35 = vst.msk [vmem:[#allocation2 + $0x48] sm:$0xff] %vm25_vm0, %v800_v3  ;;  %36 = vst.msk [vmem:[#allocation2 + $0x50] sm:$0xff] %vm25_vm0, %v800_v3  ;;  %740 = vmatprep.subr.bf16.mxu0 %v739_v6  ;;  %v291_v15 = vld [vmem:[%s1120_s1] sm:$0xff]  ;;  %709 = vmatprep.subr.mxu1 %v307_v14  ;;  %v293_v17 = vld [vmem:[%s1120_s1 + $0x10] sm:$0xff]  ;;  %v49_v47 = vunpack.c.3.s8 %v874_v12 }
   0x7   :  { %37 = vst.msk [vmem:[#allocation2 + $0x58] sm:$0xff] %vm25_vm0, %v800_v3  ;;  %38 = vst.msk [vmem:[#allocation2 + $0x60] sm:$0xff] %vm25_vm0, %v800_v3  ;;  %711 = vmatprep.mubr.msk.f32.mxu1 %vm308_vm1, %v291_v15  ;;  %v62_v18 = vcvt.s32.f32 %v46_v13  ;;  %710 = vmatpush3.msra.mxu1 %v307_v14  ;;  %v102_v20 = vld [vmem:[%s1117_s2 + $0x40] sm:$0xff]  ;;  %v103_v21 = vld [vmem:[%s1117_s2 + $0x48] sm:$0xff]  ;;  %v63_v46 = vcvt.s32.f32 %v47_v41  ;;  %v64_v49 = vcvt.s32.f32 %v48_v43 }
   0x8   :  { %39 = vst.msk [vmem:[#allocation2 + $0x68] sm:$0xff] %vm25_vm0, %v800_v3  ;;  %40 = vst.msk [vmem:[#allocation2 + $0x70] sm:$0xff] %vm25_vm0, %v800_v3  ;;  %712 = vmatmul.mubr.msk.f32.vlgmr.msra.gmra.mrb[0].mxu1 %vm308_vm1, %v292_v16  ;;  %v294_v22 = vld [vmem:[%s1120_s1 + $0x18] sm:$0xff]  ;;  %v295_v23 = vld [vmem:[%s1120_s1 + $0x20] sm:$0xff]  ;;  %v751_v24 = vpack.c.bf16 %v103_v21, %v102_v20  ;;  %v65_v52 = vcvt.s32.f32 %v49_v47 }
   0x9   :  { %41 = vst.msk [vmem:[#allocation2 + $0x78] sm:$0xff] %vm25_vm0, %v800_v3  ;;  %742 = vmatpush3.bf16.msra.mxu0 %v739_v6  ;;  %685 = vmatprep.mubr.f32.mxu0 %v62_v18  ;;  %v104_v25 = vld [vmem:[%s1117_s2 + $0x50] sm:$0xff]  ;;  %v105_v26 = vld [vmem:[%s1117_s2 + $0x58] sm:$0xff]  ;;  %v296_v27 = vld [vmem:[%s1120_s1 + $0x28] sm:$0xff] }
   0xa   :  { %744 = vmatprep.subr.bf16.mxu0 %v743_v9  ;;  %714 = vmatprep.mubr.msk.f32.mxu1 %vm308_vm1, %v293_v17  ;;  %v297_v28 = vld [vmem:[%s1120_s1 + $0x30] sm:$0xff]  ;;  %v755_v29 = vpack.c.bf16 %v105_v26, %v104_v25  ;;  %v106_v30 = vld [vmem:[%s1117_s2 + $0x60] sm:$0xff]  ;;  %v107_v31 = vld [vmem:[%s1117_s2 + $0x68] sm:$0xff] }
   0xb   :  { %v298_v32 = vld [vmem:[%s1120_s1 + $0x38] sm:$0xff]  ;;  %v299_v33 = vld [vmem:[%s1120_s1 + $0x40] sm:$0xff]  ;;  %v759_v34 = vpack.c.bf16 %v107_v31, %v106_v30  ;;  %v108_v35 = vld [vmem:[%s1117_s2 + $0x70] sm:$0xff] }
   0xc   :  { %715 = vmatmul.mubr.msk.f32.gmra.mrb[2].mxu1 %vm308_vm1, %v294_v22  ;;  %v109_v36 = vld [vmem:[%s1117_s2 + $0x78] sm:$0xff]  ;;  %v300_v37 = vld [vmem:[%s1120_s1 + $0x48] sm:$0xff]  ;;  %v301_v38 = vld [vmem:[%s1120_s1 + $0x50] sm:$0xff] }
   0xd   :  { %746 = vmatpush3.bf16.msra.mxu0 %v743_v9  ;;  %717 = vmatprep.mubr.msk.f32.mxu1 %vm308_vm1, %v295_v23  ;;  %v763_v39 = vpack.c.bf16 %v109_v36, %v108_v35  ;;  %v302_v40 = vld [vmem:[%s1120_s1 + $0x58] sm:$0xff]  ;;  %v303_v42 = vld [vmem:[%s1120_s1 + $0x60] sm:$0xff]  ;;  %v43_v44 = vld [vmem:[%s1118_s0 + $0x8] sm:$0xff] }
   0xe   :  { %748 = vmatprep.subr.bf16.mxu0 %v747_v19  ;;  %v304_v45 = vld [vmem:[%s1120_s1 + $0x68] sm:$0xff]  ;;  %v305_v48 = vld [vmem:[%s1120_s1 + $0x70] sm:$0xff]  ;;  %v50_v50 = vunpack.c.0.s8 %v43_v44  ;;  %v306_v51 = vld [vmem:[%s1120_s1 + $0x78] sm:$0xff]  ;;  %v51_v53 = vunpack.c.1.s8 %v43_v44  ;;  %v52_v55 = vunpack.c.2.s8 %v43_v44  ;;  %v53_v58 = vunpack.c.3.s8 %v43_v44 }
   0xf   :  { %v44_v56 = vld [vmem:[%s1118_s0 + $0x10] sm:$0xff]  ;;  %v45_v1 = vld [vmem:[%s1118_s0 + $0x18] sm:$0xff]  ;;  %v79_v26 = vld [vmem:[#allocation2 + $0x8] sm:$0xff] }
  0x10   :  { %718 = vmatmul.mubr.msk.f32.gmra.mrb[4].mxu1 %vm308_vm1, %v296_v27  ;;  %v66_v54 = vcvt.s32.f32 %v50_v50  ;;  %v67_v57 = vcvt.s32.f32 %v51_v53  ;;  %v68_v59 = vcvt.s32.f32 %v52_v55  ;;  %v54_v60 = vunpack.c.0.s8 %v44_v56  ;;  %v80_v36 = vld [vmem:[#allocation2 + $0x10] sm:$0xff]  ;;  %v82_v43 = vld [vmem:[#allocation2 + $0x20] sm:$0xff]  ;;  %v85_v50 = vld [vmem:[#allocation2 + $0x38] sm:$0xff] }
  0x11   :  { %750 = vmatpush3.bf16.msra.mxu0 %v747_v19  ;;  %720 = vmatprep.mubr.msk.f32.mxu1 %vm308_vm1, %v297_v28  ;;  %v69_v61 = vcvt.s32.f32 %v53_v58  ;;  %v55_v62 = vunpack.c.1.s8 %v44_v56  ;;  %v56_v0 = vunpack.c.2.s8 %v44_v56  ;;  %v57_v3 = vunpack.c.3.s8 %v44_v56  ;;  %v78_v28 = vld [vmem:[#allocation2] sm:$0xff]  ;;  %v84_v53 = vld [vmem:[#allocation2 + $0x30] sm:$0xff] }
  0x12   :  { %752 = vmatprep.subr.bf16.mxu0 %v751_v24  ;;  %v70_v63 = vcvt.s32.f32 %v54_v60  ;;  %v58_v5 = vunpack.c.0.s8 %v45_v1  ;;  %v59_v7 = vunpack.c.1.s8 %v45_v1  ;;  %v60_v9 = vunpack.c.2.s8 %v45_v1 }
  0x13   :  { %v71_v2 = vcvt.s32.f32 %v55_v62  ;;  %v72_v4 = vcvt.s32.f32 %v56_v0  ;;  %v73_v6 = vcvt.s32.f32 %v57_v3  ;;  %v61_v11 = vunpack.c.3.s8 %v45_v1  ;;  %v87_v62 = vld [vmem:[#allocation2 + $0x48] sm:$0xff]  ;;  %v86_v1 = vld [vmem:[#allocation2 + $0x40] sm:$0xff] }
  0x14   :  { %721 = vmatmul.mubr.msk.f32.gmra.mrb[6].mxu1 %vm308_vm1, %v298_v32  ;;  %v74_v8 = vcvt.s32.f32 %v58_v5  ;;  %v75_v10 = vcvt.s32.f32 %v59_v7  ;;  %v76_v12 = vcvt.s32.f32 %v60_v9 }
  0x15   :  { %754 = vmatpush3.bf16.msra.mxu0 %v751_v24  ;;  %723 = vmatprep.mubr.msk.f32.mxu1 %vm308_vm1, %v299_v33  ;;  %v77_v13 = vcvt.s32.f32 %v61_v11 }
  0x16   :  { %756 = vmatprep.subr.bf16.mxu0 %v755_v29 }
  0x18   :  { %724 = vmatmul.mubr.msk.f32.gmra.mrb[8].mxu1 %vm308_vm1, %v300_v37 }
  0x19   :  { %758 = vmatpush3.bf16.msra.mxu0 %v755_v29  ;;  %726 = vmatprep.mubr.msk.f32.mxu1 %vm308_vm1, %v301_v38 }
  0x1a   :  { %760 = vmatprep.subr.bf16.mxu0 %v759_v34 }
  0x1c   :  { %727 = vmatmul.mubr.msk.f32.gmra.mrb[10].mxu1 %vm308_vm1, %v302_v40 }
  0x1d   :  { %762 = vmatpush3.bf16.msra.mxu0 %v759_v34  ;;  %729 = vmatprep.mubr.msk.f32.mxu1 %vm308_vm1, %v303_v42  ;;  %v81_v34 = vld [vmem:[#allocation2 + $0x18] sm:$0xff]  ;;  %v83_v42 = vld [vmem:[#allocation2 + $0x28] sm:$0xff] }
  0x1e   :  { %764 = vmatprep.subr.bf16.mxu0 %v763_v39 }
  0x20   :  { %730 = vmatmul.mubr.msk.f32.gmra.mrb[12].mxu1 %vm308_vm1, %v304_v45 }
  0x21   :  { %766 = vmatpush3.bf16.msra.mxu0 %v763_v39  ;;  %732 = vmatprep.mubr.msk.f32.mxu1 %vm308_vm1, %v305_v48 }
  0x24   :  { %686 = vmatmul.mubr.f32.vlgmr.msra.gmra.mrb[0].mxu0 %v63_v46  ;;  %733 = vmatmul.mubr.msk.f32.gmra.mrb[14].mxu1 %vm308_vm1, %v306_v51 }
  0x25   :  { %688 = vmatprep.mubr.f32.mxu0 %v64_v49  ;;  %v1011_v49 = vstv %s1121_s4 }
  0x28   :  { %689 = vmatmul.mubr.f32.gmra.mrb[2].mxu0 %v65_v52 }
  0x29   :  { %691 = vmatprep.mubr.f32.mxu0 %v66_v54 }
  0x2c   :  { %692 = vmatmul.mubr.f32.gmra.mrb[4].mxu0 %v67_v57 }
  0x2d   :  { %694 = vmatprep.mubr.f32.mxu0 %v68_v59 }
  0x30   :  { %695 = vmatmul.mubr.f32.gmra.mrb[6].mxu0 %v69_v61 }
  0x31   :  { %697 = vmatprep.mubr.f32.mxu0 %v70_v63 }
  0x34   :  { %698 = vmatmul.mubr.f32.gmra.mrb[8].mxu0 %v71_v2 }
  0x35   :  { %700 = vmatprep.mubr.f32.mxu0 %v72_v4 }
  0x38   :  { %701 = vmatmul.mubr.f32.gmra.mrb[10].mxu0 %v73_v6 }
  0x39   :  { %703 = vmatprep.mubr.f32.mxu0 %v74_v8 }
  0x3c   :  { %704 = vmatmul.mubr.f32.gmra.mrb[12].mxu0 %v75_v10  ;;  %v89_v10 = vld [vmem:[#allocation2 + $0x58] sm:$0xff] }
  0x3d   :  { %706 = vmatprep.mubr.f32.mxu0 %v76_v12 }
  0x40   :  { %707 = vmatmul.mubr.f32.gmra.mrb[14].mxu0 %v77_v13  ;;  %v88_v13 = vld [vmem:[#allocation2 + $0x50] sm:$0xff] }
  0xdb   :  { %v713_v14 = vpop.f32.mrb[0].mxu1 }
  0xdc   :  { %v423_v15 = vpop.f32.mrb[1].mxu1 }
  0xdf   :  { %v716_v16 = vpop.f32.mrb[2].mxu1 }
  0xe0   :  { %v433_v17 = vpop.f32.mrb[3].mxu1 }
  0xe3   :  { %v980_v18 = vpop.f32.mrb[4].mxu1 }
  0xe4   :  { %v982_v19 = vpop.f32.mrb[5].mxu1 }
  0xe7   :  { %v984_v20 = vpop.f32.mrb[6].mxu1 }
  0xe8   :  { %v986_v21 = vpop.f32.mrb[7].mxu1 }
  0xeb   :  { %v988_v22 = vpop.f32.mrb[8].mxu1 }
  0xec   :  { %v990_v23 = vpop.f32.mrb[9].mxu1 }
  0xef   :  { %v992_v24 = vpop.f32.mrb[10].mxu1 }
  0xf0   :  { %v994_v25 = vpop.f32.mrb[11].mxu1 }
  0xf3   :  { %v996_v27 = vpop.f32.mrb[12].mxu1 }
  0xf4   :  { %v998_v29 = vpop.f32.mrb[13].mxu1 }
  0xf7   :  { %v687_v30 = vpop.f32.mrb[0].mxu0  ;;  %v1000_v35 = vpop.f32.mrb[14].mxu1 }
  0xf8   :  { %v256_v31 = vadd.f32 %v687_v30, %v79_v26  ;;  %v176_v32 = vpop.f32.mrb[1].mxu0  ;;  %v1003_v37 = vpop.f32.mrb[15].mxu1 }
  0xf9   :  { %v255_v33 = vadd.f32 %v176_v32, %v78_v28  ;;  %v91_v32 = vld [vmem:[#allocation2 + $0x68] sm:$0xff] }
  0xfa   :  { %273 = vst.msk [vmem:[#allocation2 + $0x8] sm:$0xff] %vm25_vm0, %v256_v31 }
  0xfb   :  { %272 = vst.msk [vmem:[#allocation2] sm:$0xff] %vm25_vm0, %v255_v33  ;;  %v690_v38 = vpop.f32.mrb[2].mxu0 }
  0xfc   :  { %v258_v39 = vadd.f32 %v690_v38, %v81_v34  ;;  %v186_v40 = vpop.f32.mrb[3].mxu0  ;;  %v90_v34 = vld [vmem:[#allocation2 + $0x60] sm:$0xff] }
  0xfd   :  { %v257_v41 = vadd.f32 %v186_v40, %v80_v36 }
  0xfe   :  { %275 = vst.msk [vmem:[#allocation2 + $0x18] sm:$0xff] %vm25_vm0, %v258_v39 }
  0xff   :  { %274 = vst.msk [vmem:[#allocation2 + $0x10] sm:$0xff] %vm25_vm0, %v257_v41  ;;  %v693_v44 = vpop.f32.mrb[4].mxu0 }
 0x100   :  { %v260_v45 = vadd.f32 %v693_v44, %v83_v42  ;;  %v196_v46 = vpop.f32.mrb[5].mxu0 }
 0x101   :  { %v259_v47 = vadd.f32 %v196_v46, %v82_v43  ;;  %v503_v48 = vld [vmem:[#allocation2 + $0x8] sm:$0xff] }
 0x102   :  { %277 = vst.msk [vmem:[#allocation2 + $0x28] sm:$0xff] %vm25_vm0, %v260_v45  ;;  %v519_v51 = vadd.f32 %v713_v14, %v503_v48  ;;  %v502_v52 = vld [vmem:[#allocation2] sm:$0xff]  ;;  %v93_v45 = vld [vmem:[#allocation2 + $0x78] sm:$0xff] }
 0x103   :  { %276 = vst.msk [vmem:[#allocation2 + $0x20] sm:$0xff] %vm25_vm0, %v259_v47  ;;  %v518_v54 = vadd.f32 %v502_v52, %v423_v15  ;;  %v696_v55 = vpop.f32.mrb[6].mxu0  ;;  %v92_v47 = vld [vmem:[#allocation2 + $0x70] sm:$0xff] }
 0x104   :  { %v537_v56 = vadd.f32 %v1011_v49, %v519_v51  ;;  %v262_v57 = vadd.f32 %v696_v55, %v85_v50  ;;  %v206_v58 = vpop.f32.mrb[7].mxu0 }
 0x105   :  { %v536_v59 = vadd.f32 %v1011_v49, %v518_v54  ;;  %v261_v60 = vadd.f32 %v206_v58, %v84_v53  ;;  %v505_v61 = vld [vmem:[#allocation2 + $0x18] sm:$0xff] }
 0x106   :  { %768 = vtanh.f32 %v537_v56  ;;  %279 = vst.msk [vmem:[#allocation2 + $0x38] sm:$0xff] %vm25_vm0, %v262_v57  ;;  %v521_v63 = vadd.f32 %v716_v16, %v505_v61  ;;  %v504_v0 = vld [vmem:[#allocation2 + $0x10] sm:$0xff] }
 0x107   :  { %770 = vtanh.f32 %v536_v59  ;;  %278 = vst.msk [vmem:[#allocation2 + $0x30] sm:$0xff] %vm25_vm0, %v261_v60  ;;  %v520_v2 = vadd.f32 %v504_v0, %v433_v17  ;;  %v699_v3 = vpop.f32.mrb[8].mxu0 }
 0x108   :  { %v539_v4 = vadd.f32 %v1011_v49, %v521_v63  ;;  %v264_v5 = vadd.f32 %v699_v3, %v87_v62  ;;  %v216_v6 = vpop.f32.mrb[9].mxu0 }
 0x109   :  { %v538_v7 = vadd.f32 %v1011_v49, %v520_v2  ;;  %v263_v8 = vadd.f32 %v216_v6, %v86_v1  ;;  %v507_v9 = vld [vmem:[#allocation2 + $0x28] sm:$0xff] }
 0x10a   :  { %772 = vtanh.f32 %v539_v4  ;;  %281 = vst.msk [vmem:[#allocation2 + $0x48] sm:$0xff] %vm25_vm0, %v264_v5  ;;  %v523_v11 = vadd.f32 %v980_v18, %v507_v9  ;;  %v506_v12 = vld [vmem:[#allocation2 + $0x20] sm:$0xff] }
 0x10b   :  { %774 = vtanh.f32 %v538_v7  ;;  %280 = vst.msk [vmem:[#allocation2 + $0x40] sm:$0xff] %vm25_vm0, %v263_v8  ;;  %v522_v14 = vadd.f32 %v506_v12, %v982_v19  ;;  %v702_v15 = vpop.f32.mrb[10].mxu0 }
 0x10c   :  { %v541_v16 = vadd.f32 %v1011_v49, %v523_v11  ;;  %v266_v17 = vadd.f32 %v702_v15, %v89_v10  ;;  %v226_v26 = vpop.f32.mrb[11].mxu0 }
 0x10d   :  { %v540_v28 = vadd.f32 %v1011_v49, %v522_v14  ;;  %v265_v30 = vadd.f32 %v226_v26, %v88_v13  ;;  %v509_v31 = vld [vmem:[#allocation2 + $0x38] sm:$0xff] }
 0x10e   :  { %776 = vtanh.f32 %v541_v16  ;;  %283 = vst.msk [vmem:[#allocation2 + $0x58] sm:$0xff] %vm25_vm0, %v266_v17  ;;  %v525_v18 = vadd.f32 %v984_v20, %v509_v31  ;;  %v508_v33 = vld [vmem:[#allocation2 + $0x30] sm:$0xff] }
 0x10f   :  { %778 = vtanh.f32 %v540_v28  ;;  %282 = vst.msk [vmem:[#allocation2 + $0x50] sm:$0xff] %vm25_vm0, %v265_v30  ;;  %v524_v19 = vadd.f32 %v508_v33, %v986_v21  ;;  %v705_v36 = vpop.f32.mrb[12].mxu0 }
 0x110   :  { %v769_v38 = vpop.eup %768  ;;  %v543_v39 = vadd.f32 %v1011_v49, %v525_v18  ;;  %v268_v40 = vadd.f32 %v705_v36, %v91_v32  ;;  %v236_v41 = vpop.f32.mrb[13].mxu0 }
 0x111   :  { %v771_v42 = vpop.eup %770  ;;  %569 = vst.msk [vmem:[%s1122_s5 + $0x8] sm:$0xff] %vm25_vm0, %v769_v38  ;;  %v542_v20 = vadd.f32 %v1011_v49, %v524_v19  ;;  %v267_v43 = vadd.f32 %v236_v41, %v90_v34  ;;  %v511_v44 = vld [vmem:[#allocation2 + $0x48] sm:$0xff] }
 0x112   :  { %568 = vst.msk [vmem:[%s1122_s5] sm:$0xff] %vm25_vm0, %v771_v42  ;;  %780 = vtanh.f32 %v543_v39  ;;  %285 = vst.msk [vmem:[#allocation2 + $0x68] sm:$0xff] %vm25_vm0, %v268_v40  ;;  %v527_v21 = vadd.f32 %v988_v22, %v511_v44  ;;  %v510_v46 = vld [vmem:[#allocation2 + $0x40] sm:$0xff] }
 0x113   :  { %782 = vtanh.f32 %v542_v20  ;;  %284 = vst.msk [vmem:[#allocation2 + $0x60] sm:$0xff] %vm25_vm0, %v267_v43  ;;  %v526_v48 = vadd.f32 %v510_v46, %v990_v23  ;;  %v708_v50 = vpop.f32.mrb[14].mxu0 }
 0x114   :  { %v773_v51 = vpop.eup %772  ;;  %v545_v52 = vadd.f32 %v1011_v49, %v527_v21  ;;  %v270_v53 = vadd.f32 %v708_v50, %v93_v45  ;;  %v246_v54 = vpop.f32.mrb[15].mxu0 }
 0x115   :  { %v775_v55 = vpop.eup %774  ;;  %571 = vst.msk [vmem:[%s1122_s5 + $0x18] sm:$0xff] %vm25_vm0, %v773_v51  ;;  %v544_v22 = vadd.f32 %v1011_v49, %v526_v48  ;;  %v269_v56 = vadd.f32 %v246_v54, %v92_v47  ;;  %v513_v57 = vld [vmem:[#allocation2 + $0x58] sm:$0xff] }
 0x116   :  { %570 = vst.msk [vmem:[%s1122_s5 + $0x10] sm:$0xff] %vm25_vm0, %v775_v55  ;;  %784 = vtanh.f32 %v545_v52  ;;  %287 = vst.msk [vmem:[#allocation2 + $0x78] sm:$0xff] %vm25_vm0, %v270_v53  ;;  %v529_v23 = vadd.f32 %v992_v24, %v513_v57  ;;  %v512_v58 = vld [vmem:[#allocation2 + $0x50] sm:$0xff] }
 0x117   :  { %786 = vtanh.f32 %v544_v22  ;;  %286 = vst.msk [vmem:[#allocation2 + $0x70] sm:$0xff] %vm25_vm0, %v269_v56  ;;  %v528_v59 = vadd.f32 %v512_v58, %v994_v25 }
 0x118   :  { %v777_v60 = vpop.eup %776  ;;  %v547_v61 = vadd.f32 %v1011_v49, %v529_v23 }
 0x119   :  { %v779_v62 = vpop.eup %778  ;;  %573 = vst.msk [vmem:[%s1122_s5 + $0x28] sm:$0xff] %vm25_vm0, %v777_v60  ;;  %v546_v63 = vadd.f32 %v1011_v49, %v528_v59  ;;  %v515_v0 = vld [vmem:[#allocation2 + $0x68] sm:$0xff] }
 0x11a   :  { %572 = vst.msk [vmem:[%s1122_s5 + $0x20] sm:$0xff] %vm25_vm0, %v779_v62  ;;  %788 = vtanh.f32 %v547_v61  ;;  %v531_v24 = vadd.f32 %v996_v27, %v515_v0  ;;  %v514_v25 = vld [vmem:[#allocation2 + $0x60] sm:$0xff] }
 0x11b   :  { %790 = vtanh.f32 %v546_v63  ;;  %v530_v1 = vadd.f32 %v514_v25, %v998_v29 }
 0x11c   :  { %v781_v2 = vpop.eup %780  ;;  %v549_v3 = vadd.f32 %v1011_v49, %v531_v24 }
 0x11d   :  { %v783_v4 = vpop.eup %782  ;;  %575 = vst.msk [vmem:[%s1122_s5 + $0x38] sm:$0xff] %vm25_vm0, %v781_v2  ;;  %v548_v5 = vadd.f32 %v1011_v49, %v530_v1  ;;  %v517_v6 = vld [vmem:[#allocation2 + $0x78] sm:$0xff] }
 0x11e   :  { %574 = vst.msk [vmem:[%s1122_s5 + $0x30] sm:$0xff] %vm25_vm0, %v783_v4  ;;  %792 = vtanh.f32 %v549_v3  ;;  %v533_v27 = vadd.f32 %v1000_v35, %v517_v6  ;;  %v516_v29 = vld [vmem:[#allocation2 + $0x70] sm:$0xff] }
 0x11f   :  { %794 = vtanh.f32 %v548_v5  ;;  %v532_v7 = vadd.f32 %v516_v29, %v1003_v37 }
 0x120   :  { %v785_v8 = vpop.eup %784  ;;  %v551_v9 = vadd.f32 %v1011_v49, %v533_v27 }
 0x121   :  { %v787_v10 = vpop.eup %786  ;;  %577 = vst.msk [vmem:[%s1122_s5 + $0x48] sm:$0xff] %vm25_vm0, %v785_v8  ;;  %v550_v11 = vadd.f32 %v1011_v49, %v532_v7 }
 0x122   :  { %576 = vst.msk [vmem:[%s1122_s5 + $0x40] sm:$0xff] %vm25_vm0, %v787_v10  ;;  %796 = vtanh.f32 %v551_v9 }
 0x123   :  { %798 = vtanh.f32 %v550_v11 }
 0x124   :  { %v789_v35 = vpop.eup %788 }
 0x125   :  { %v791_v37 = vpop.eup %790  ;;  %579 = vst.msk [vmem:[%s1122_s5 + $0x58] sm:$0xff] %vm25_vm0, %v789_v35 }
 0x126   :  { %578 = vst.msk [vmem:[%s1122_s5 + $0x50] sm:$0xff] %vm25_vm0, %v791_v37 }
 0x128   :  { %v793_v49 = vpop.eup %792 }
 0x129   :  { %v795_v12 = vpop.eup %794  ;;  %581 = vst.msk [vmem:[%s1122_s5 + $0x68] sm:$0xff] %vm25_vm0, %v793_v49 }
 0x12a   :  { %580 = vst.msk [vmem:[%s1122_s5 + $0x60] sm:$0xff] %vm25_vm0, %v795_v12 }
 0x12c   :  { %v797_v13 = vpop.eup %796 }
 0x12d   :  { %v799_v14 = vpop.eup %798  ;;  %583 = vst.msk [vmem:[%s1122_s5 + $0x78] sm:$0xff] %vm25_vm0, %v797_v13 }
 0x12e   :  { %582 = vst.msk [vmem:[%s1122_s5 + $0x70] sm:$0xff] %vm25_vm0, %v799_v14 }

</bundles_post_ra>
